<compile_context>
chip_gen: v5e
topology: v5e:2x2
jax: 0.10.0
libtpu: 0.0.40
codegen_flags: <defaults>
</compile_context>

<pallas_src>
import functools
import math

import jax
import jax.numpy as jnp
from jax.experimental import pallas as pl
from jax.experimental.pallas import tpu as pltpu


# ----------------------------------------------------------------------------
# Kernels
# ----------------------------------------------------------------------------
def _adapter_rows_kernel(x_ref, w1s_ref, w2_ref, o_ref, *, scalar):
    """Row layout: batch rows on sublanes, feature axis on the 128 lanes.

    x_ref  : (tile, C)   native dtype (C may be a packed width g*c_in)
    w1s_ref: (C, H)      = (scalar * W1)^T           (or its block-diag expansion)
    w2_ref : (H, C)      = W2^T                      (or its block-diag expansion)
    o_ref  : (tile, C)
    """
    x = x_ref[...]
    h = jnp.maximum(
        jnp.dot(x, w1s_ref[...], preferred_element_type=jnp.float32), 0.0)
    y = jnp.maximum(
        jnp.dot(h.astype(w2_ref.dtype), w2_ref[...],
                preferred_element_type=jnp.float32), 0.0)
    s = scalar * x.astype(jnp.float32)          # gate input, recomputed on VPU
    o_ref[...] = (jax.nn.sigmoid(y) * s).astype(o_ref.dtype)


def _adapter_lanes_kernel(xt_ref, w1s_ref, w2_ref, ot_ref, *, scalar):
    """Transposed fallback: batch on the 128-lane axis.

    xt_ref : (c_in, tile)   native dtype (x transposed)
    w1s_ref: (hidden, c_in) = scalar * W1  (PyTorch layout)
    w2_ref : (c_in, hidden) = W2           (PyTorch layout)
    ot_ref : (c_in, tile)
    """
    xt = xt_ref[...]
    h = jnp.maximum(
        jnp.dot(w1s_ref[...], xt, preferred_element_type=jnp.float32), 0.0)
    y = jnp.maximum(
        jnp.dot(w2_ref[...], h.astype(w2_ref.dtype),
                preferred_element_type=jnp.float32), 0.0)
    s = scalar * xt.astype(jnp.float32)
    ot_ref[...] = (jax.nn.sigmoid(y) * s).astype(ot_ref.dtype)


# ----------------------------------------------------------------------------
# Host-side helpers
# ----------------------------------------------------------------------------
def _block_diag(w, g):
    """(a, b) -> (g*a, g*b) block-diagonal with `w` repeated g times."""
    a, b = w.shape
    eye = jnp.eye(g, dtype=w.dtype)
    return (eye[:, None, :, None] * w[None, :, None, :]).reshape(g * a, g * b)


def _pick_tile(rows, lane_dense):
    """Largest tile (<=512) dividing `rows` while keeping the grid length >= 2."""
    candidates = (512, 384, 256, 128) if lane_dense \
        else (512, 384, 256, 128, 64, 32, 16, 8)
    for t in candidates:
        if rows % t == 0 and rows // t >= 2:
            return t
    return rows  # single block covering everything


# ----------------------------------------------------------------------------
# Wrapper
# ----------------------------------------------------------------------------
def weight_adapter(x, w1, w2, *, scalar=10.0, tile_n=None,
                   vmem_limit_bytes=64 * 1024 * 1024):
    """Pallas forward of WeightAdapter.

    x : (N, c_in)       feature vectors
    w1: (hidden, c_in)  Linear(c_in, hidden).weight (PyTorch layout, hidden=c_in//r)
    w2: (c_in, hidden)  Linear(hidden, c_in).weight (PyTorch layout)
    """
    n, c_in = x.shape
    hidden = w1.shape[0]
    assert w1.shape == (hidden, c_in), w1.shape
    assert w2.shape == (c_in, hidden), w2.shape

    # Fold the input pre-scale into the first matmul (host-side, done once).
    w1s = jnp.asarray(scalar, dtype=w1.dtype) * w1

    # ---- path selection -----------------------------------------------------
    if c_in % 128 == 0:
        path, g = "rows", 1
    else:
        g = 128 // math.gcd(c_in, 128)   # smallest g with (g * c_in) % 128 == 0
        packed_ok = (n % g == 0) and (g * c_in <= 1024) and (g <= 64)
        path = "packed" if packed_ok else "lanes"

    compiler_params = pltpu.CompilerParams(
        dimension_semantics=("parallel",),
        vmem_limit_bytes=vmem_limit_bytes,
    )

    def run(single_buffer_weights):
        def weight_spec(shape):
            if single_buffer_weights:
                # Constant index_map across the grid: one VMEM copy is enough.
                return pl.BlockSpec(shape, lambda i: (0, 0),
                                    pipeline_mode=pl.Buffered(1))
            return pl.BlockSpec(shape, lambda i: (0, 0))

        if path in ("rows", "packed"):
            if path == "packed":
                rows, width, hid = n // g, g * c_in, g * hidden
                x_in = x.reshape(rows, width)          # free (contiguous)
                wa = _block_diag(w1s.T, g)             # (g*C, g*H)
                wb = _block_diag(w2.T, g)              # (g*H, g*C)
            else:
                rows, width, hid = n, c_in, hidden
                x_in = x
                wa = w1s.T                             # (C, H)
                wb = w2.T                              # (H, C)

            t = tile_n if tile_n is not None else _pick_tile(rows, lane_dense=False)
            assert rows % t == 0, "rows must be a multiple of the tile size"
            out = pl.pallas_call(
                functools.partial(_adapter_rows_kernel, scalar=float(scalar)),
                out_shape=jax.ShapeDtypeStruct((rows, width), x.dtype),
                grid_spec=pltpu.PrefetchScalarGridSpec(
                    num_scalar_prefetch=0,
                    grid=(rows // t,),
                    in_specs=[
                        pl.BlockSpec((t, width), lambda i: (i, 0)),   # x tile
                        weight_spec((width, hid)),                    # (scalar*W1)^T
                        weight_spec((hid, width)),                    # W2^T
                    ],
                    out_specs=pl.BlockSpec((t, width), lambda i: (i, 0)),
                ),
                compiler_params=compiler_params,
            )(x_in, wa, wb)
            return out.reshape(n, c_in) if path == "packed" else out

        # "lanes": transposed fallback (batch on the 128-lane axis).
        t = tile_n if tile_n is not None else _pick_tile(n, lane_dense=True)
        assert n % t == 0, "batch must be a multiple of the tile size"
        xt = x.T
        out_t = pl.pallas_call(
            functools.partial(_adapter_lanes_kernel, scalar=float(scalar)),
            out_shape=jax.ShapeDtypeStruct((c_in, n), x.dtype),
            grid_spec=pltpu.PrefetchScalarGridSpec(
                num_scalar_prefetch=0,
                grid=(n // t,),
                in_specs=[
                    pl.BlockSpec((c_in, t), lambda i: (0, i)),        # x^T tile
                    weight_spec((hidden, c_in)),                      # scalar*W1
                    weight_spec((c_in, hidden)),                      # W2
                ],
                out_specs=pl.BlockSpec((c_in, t), lambda i: (0, i)),
            ),
            compiler_params=compiler_params,
        )(xt, w1s, w2)
        return out_t.T

    try:
        return run(single_buffer_weights=True)
    except Exception:
        # This jax build does not accept pipeline_mode=pl.Buffered(1);
        # fall back to default double-buffered weights (identical numerics).
        return run(single_buffer_weights=False)


# ----------------------------------------------------------------------------
# Pure-JAX reference (mirrors the PyTorch forward exactly)
# ----------------------------------------------------------------------------
def weight_adapter_ref(x, w1, w2, scalar=10.0):
    s = scalar * x
    h = jnp.maximum(s @ w1.T, 0.0)
    y = jnp.maximum(h @ w2.T, 0.0)
    return jax.nn.sigmoid(y) * s


if __name__ == "__main__":
    key = jax.random.PRNGKey(0)
    keys = jax.random.split(key, 9)
    SCALAR = 10.0

    # --- Case 1: narrow channels (c_in = 32) -> packed lane-dense path (g=4).
    N1, C1, R1 = 512, 32, 4
    H1 = C1 // R1
    x1 = jax.random.normal(keys[0], (N1, C1), dtype=jnp.float32)
    b_in, b_hid = 1.0 / (C1 ** 0.5), 1.0 / (H1 ** 0.5)   # nn.Linear init bounds
    w1 = jax.random.uniform(keys[1], (H1, C1), jnp.float32, -b_in, b_in)
    w2 = jax.random.uniform(keys[2], (C1, H1), jnp.float32, -b_hid, b_hid)

    out1 = jax.block_until_ready(weight_adapter(x1, w1, w2, scalar=SCALAR))
    ref1 = weight_adapter_ref(x1, w1, w2, SCALAR)
    assert out1.shape == (N1, C1)
    assert jnp.allclose(out1, ref1, atol=1e-4, rtol=1e-4), "case 1 mismatch"

    # --- Case 2: c_in multiple of 128 -> natural row layout path.
    N2, C2, R2 = 256, 128, 4
    H2 = C2 // R2
    x2 = jax.random.normal(keys[3], (N2, C2), dtype=jnp.float32)
    b_in, b_hid = 1.0 / (C2 ** 0.5), 1.0 / (H2 ** 0.5)
    w3 = jax.random.uniform(keys[4], (H2, C2), jnp.float32, -b_in, b_in)
    w4 = jax.random.uniform(keys[5], (C2, H2), jnp.float32, -b_hid, b_hid)

    out2 = jax.block_until_ready(weight_adapter(x2, w3, w4, scalar=SCALAR))
    ref2 = weight_adapter_ref(x2, w3, w4, SCALAR)
    assert out2.shape == (N2, C2)
    assert jnp.allclose(out2, ref2, atol=1e-4, rtol=1e-4), "case 2 mismatch"

    # --- Case 3: awkward shapes (c_in=40, N not a multiple of g) -> transposed fallback.
    N3, C3, R3 = 88, 40, 4
    H3 = C3 // R3
    x3 = jax.random.normal(keys[6], (N3, C3), dtype=jnp.float32)
    b_in, b_hid = 1.0 / (C3 ** 0.5), 1.0 / (H3 ** 0.5)
    w5 = jax.random.uniform(keys[7], (H3, C3), jnp.float32, -b_in, b_in)
    w6 = jax.random.uniform(keys[8], (C3, H3), jnp.float32, -b_hid, b_hid)

    out3 = jax.block_until_ready(weight_adapter(x3, w5, w6, scalar=SCALAR))
    ref3 = weight_adapter_ref(x3, w5, w6, SCALAR)
    assert out3.shape == (N3, C3)
    assert jnp.allclose(out3, ref3, atol=1e-4, rtol=1e-4), "case 3 mismatch"

    print("KERNEL_OK")
</pallas_src>

<mosaic_0001>
module attributes {stable_mosaic.version = 11 : i64} {
  func.func @_adapter_rows_kernel(%arg0: i32, %arg1: memref<64x128xf32, #tpu.memory_space<vmem>>, %arg2: memref<128x32xf32, #tpu.memory_space<vmem>>, %arg3: memref<32x128xf32, #tpu.memory_space<vmem>>, %arg4: memref<64x128xf32, #tpu.memory_space<vmem>>) attributes {dimension_semantics = [#tpu.dimension_semantics<parallel>], iteration_bounds = array<i64: 2>, scalar_prefetch = 0 : i64, scratch_operands = 0 : i64, tpu.core_type = #tpu.core_type<tc>, window_params = [{transform_indices = @transform_0, window_bounds = array<i64: 64, 128>}, {pipeline_mode = #tpu.pipeline_mode<synchronous>, transform_indices = @transform_1, window_bounds = array<i64: 128, 32>}, {pipeline_mode = #tpu.pipeline_mode<synchronous>, transform_indices = @transform_2, window_bounds = array<i64: 32, 128>}, {transform_indices = @transform_3, window_bounds = array<i64: 64, 128>}]} {
    %c0 = arith.constant 0 : index
    %c0_0 = arith.constant 0 : index
    %0 = vector.load %arg1[%c0, %c0_0] : memref<64x128xf32, #tpu.memory_space<vmem>>, vector<64x128xf32>
    %c0_1 = arith.constant 0 : index
    %c0_2 = arith.constant 0 : index
    %1 = vector.load %arg2[%c0_1, %c0_2] : memref<128x32xf32, #tpu.memory_space<vmem>>, vector<128x32xf32>
    %cst = arith.constant dense<0.000000e+00> : vector<64x32xf32>
    %2 = tpu.matmul %0, %1, %cst {dimension_numbers = #tpu.dot_dimension_numbers<[1], [0], [0], [1], [0, 0, 1, 1], [], []>} : vector<64x128xf32>, vector<128x32xf32>, vector<64x32xf32> -> vector<64x32xf32>
    %cst_3 = arith.constant 0.000000e+00 : f32
    %3 = vector.broadcast %cst_3 : f32 to vector<64x32xf32>
    %4 = arith.maximumf %2, %3 : vector<64x32xf32>
    %c0_4 = arith.constant 0 : index
    %c0_5 = arith.constant 0 : index
    %5 = vector.load %arg3[%c0_4, %c0_5] : memref<32x128xf32, #tpu.memory_space<vmem>>, vector<32x128xf32>
    %cst_6 = arith.constant dense<0.000000e+00> : vector<64x128xf32>
    %6 = tpu.matmul %4, %5, %cst_6 {dimension_numbers = #tpu.dot_dimension_numbers<[1], [0], [0], [1], [0, 0, 1, 1], [], []>} : vector<64x32xf32>, vector<32x128xf32>, vector<64x128xf32> -> vector<64x128xf32>
    %cst_7 = arith.constant 0.000000e+00 : f32
    %7 = vector.broadcast %cst_7 : f32 to vector<64x128xf32>
    %8 = arith.maximumf %6, %7 : vector<64x128xf32>
    %cst_8 = arith.constant 1.000000e+01 : f32
    %9 = vector.broadcast %cst_8 : f32 to vector<64x128xf32>
    %10 = arith.mulf %9, %0 : vector<64x128xf32>
    %11 = arith.negf %8 : vector<64x128xf32>
    %12 = math.exp %11 : vector<64x128xf32>
    %cst_9 = arith.constant 1.000000e+00 : f32
    %13 = vector.broadcast %cst_9 : f32 to vector<64x128xf32>
    %14 = arith.addf %13, %12 : vector<64x128xf32>
    %15 = arith.divf %13, %14 : vector<64x128xf32>
    %16 = arith.mulf %15, %10 : vector<64x128xf32>
    %c0_10 = arith.constant 0 : index
    %c0_11 = arith.constant 0 : index
    %17 = vector.load %arg4[%c0_10, %c0_11] : memref<64x128xf32, #tpu.memory_space<vmem>>, vector<64x128xf32>
    tpu.vector_store %arg4[%c0_10, %c0_11], %16 {strides = array<i32>} : memref<64x128xf32, #tpu.memory_space<vmem>>, vector<64x128xf32>,
    return
  }
  func.func @transform_0(%arg0: i32) -> (i32, i32) {
    %c0_i32 = arith.constant 0 : i32
    %c0_i32_0 = arith.constant 0 : i32
    return %arg0, %c0_i32 : i32, i32
  }
  func.func @transform_1(%arg0: i32) -> (i32, i32) {
    %c0_i32 = arith.constant 0 : i32
    %c0_i32_0 = arith.constant 0 : i32
    %c0_i32_1 = arith.constant 0 : i32
    return %c0_i32, %c0_i32_0 : i32, i32
  }
  func.func @transform_2(%arg0: i32) -> (i32, i32) {
    %c0_i32 = arith.constant 0 : i32
    %c0_i32_0 = arith.constant 0 : i32
    %c0_i32_1 = arith.constant 0 : i32
    return %c0_i32, %c0_i32_0 : i32, i32
  }
  func.func @transform_3(%arg0: i32) -> (i32, i32) {
    %c0_i32 = arith.constant 0 : i32
    %c0_i32_0 = arith.constant 0 : i32
    return %arg0, %c0_i32 : i32, i32
  }
}

module attributes {stable_mosaic.version = 11 : i64} {
  func.func @_adapter_rows_kernel(%arg0: i32, %arg1: memref<64x128xf32, #tpu.memory_space<vmem>>, %arg2: memref<128x32xf32, #tpu.memory_space<vmem>>, %arg3: memref<32x128xf32, #tpu.memory_space<vmem>>, %arg4: memref<64x128xf32, #tpu.memory_space<vmem>>) attributes {dimension_semantics = [#tpu.dimension_semantics<parallel>], iteration_bounds = array<i64: 2>, scalar_prefetch = 0 : i64, scratch_operands = 0 : i64, tpu.core_type = #tpu.core_type<tc>, window_params = [{transform_indices = @transform_0, window_bounds = array<i64: 64, 128>}, {pipeline_mode = #tpu.pipeline_mode<synchronous>, transform_indices = @transform_1, window_bounds = array<i64: 128, 32>}, {pipeline_mode = #tpu.pipeline_mode<synchronous>, transform_indices = @transform_2, window_bounds = array<i64: 32, 128>}, {transform_indices = @transform_3, window_bounds = array<i64: 64, 128>}]} {
    %c0 = arith.constant 0 : index
    %c0_0 = arith.constant 0 : index
    %0 = vector.load %arg1[%c0, %c0_0] : memref<64x128xf32, #tpu.memory_space<vmem>>, vector<64x128xf32>
    %c0_1 = arith.constant 0 : index
    %c0_2 = arith.constant 0 : index
    %1 = vector.load %arg2[%c0_1, %c0_2] : memref<128x32xf32, #tpu.memory_space<vmem>>, vector<128x32xf32>
    %cst = arith.constant dense<0.000000e+00> : vector<64x32xf32>
    %2 = tpu.matmul %0, %1, %cst {dimension_numbers = #tpu.dot_dimension_numbers<[1], [0], [0], [1], [0, 0, 1, 1], [], []>} : vector<64x128xf32>, vector<128x32xf32>, vector<64x32xf32> -> vector<64x32xf32>
    %cst_3 = arith.constant 0.000000e+00 : f32
    %3 = vector.broadcast %cst_3 : f32 to vector<64x32xf32>
    %4 = arith.maximumf %2, %3 : vector<64x32xf32>
    %c0_4 = arith.constant 0 : index
    %c0_5 = arith.constant 0 : index
    %5 = vector.load %arg3[%c0_4, %c0_5] : memref<32x128xf32, #tpu.memory_space<vmem>>, vector<32x128xf32>
    %cst_6 = arith.constant dense<0.000000e+00> : vector<64x128xf32>
    %6 = tpu.matmul %4, %5, %cst_6 {dimension_numbers = #tpu.dot_dimension_numbers<[1], [0], [0], [1], [0, 0, 1, 1], [], []>} : vector<64x32xf32>, vector<32x128xf32>, vector<64x128xf32> -> vector<64x128xf32>
    %cst_7 = arith.constant 0.000000e+00 : f32
    %7 = vector.broadcast %cst_7 : f32 to vector<64x128xf32>
    %8 = arith.maximumf %6, %7 : vector<64x128xf32>
    %cst_8 = arith.constant 1.000000e+01 : f32
    %9 = vector.broadcast %cst_8 : f32 to vector<64x128xf32>
    %10 = arith.mulf %9, %0 : vector<64x128xf32>
    %11 = arith.negf %8 : vector<64x128xf32>
    %12 = math.exp %11 : vector<64x128xf32>
    %cst_9 = arith.constant 1.000000e+00 : f32
    %13 = vector.broadcast %cst_9 : f32 to vector<64x128xf32>
    %14 = arith.addf %13, %12 : vector<64x128xf32>
    %15 = arith.divf %13, %14 : vector<64x128xf32>
    %16 = arith.mulf %15, %10 : vector<64x128xf32>
    %c0_10 = arith.constant 0 : index
    %c0_11 = arith.constant 0 : index
    %17 = vector.load %arg4[%c0_10, %c0_11] : memref<64x128xf32, #tpu.memory_space<vmem>>, vector<64x128xf32>
    tpu.vector_store %arg4[%c0_10, %c0_11], %16 {strides = array<i32>} : memref<64x128xf32, #tpu.memory_space<vmem>>, vector<64x128xf32>,
    return
  }
  func.func @transform_0(%arg0: i32) -> (i32, i32) {
    %c0_i32 = arith.constant 0 : i32
    %c0_i32_0 = arith.constant 0 : i32
    return %arg0, %c0_i32 : i32, i32
  }
  func.func @transform_1(%arg0: i32) -> (i32, i32) {
    %c0_i32 = arith.constant 0 : i32
    %c0_i32_0 = arith.constant 0 : i32
    %c0_i32_1 = arith.constant 0 : i32
    return %c0_i32, %c0_i32_0 : i32, i32
  }
  func.func @transform_2(%arg0: i32) -> (i32, i32) {
    %c0_i32 = arith.constant 0 : i32
    %c0_i32_0 = arith.constant 0 : i32
    %c0_i32_1 = arith.constant 0 : i32
    return %c0_i32, %c0_i32_0 : i32, i32
  }
  func.func @transform_3(%arg0: i32) -> (i32, i32) {
    %c0_i32 = arith.constant 0 : i32
    %c0_i32_0 = arith.constant 0 : i32
    return %arg0, %c0_i32 : i32, i32
  }
}

</mosaic_0001>

<bundles_post_ra>
// kernel: tpu_custom_call.1
= control target key start
LH: loop header
LB: loop body
LE: loop exit
PB: predicated region body
PF: predicated region fallthrough
CT: control target
= control target key end

     0   :  { %8 = vsyncpa [#allocation3], 0  ;;  %s1007_s0 = inlined_call_operand.vmem [shape: f32[128,128], index: 0, kind: input, shape index: {}]   ;;  %s1008_s1 = inlined_call_operand.vmem [shape: f32[128,32], index: 1, kind: input, shape index: {}]   ;;  %s1009_s2 = inlined_call_operand.vmem [shape: f32[32,128], index: 2, kind: input, shape index: {}]   ;;  %s1010_s3 = inlined_call_operand.hbm [shape: f32[128,128], index: 3, kind: output, shape index: {}]  }
   0x1   :  { %10 = vsyncpa [#allocation3 + $0x1], 0  ;;  %s801_s12 = smov 0   ;;  %s803_s13 = smov 0  }
   0x2   :  { %s805_s14 = smov 0   ;;  %s807_s15 = smov 0  }
   0x3 LB: > { %s822_s16 = sadd.s32 4294967295, %s777_s15   ;;  %s577_s17 = sadd.s32 4294967294, %s777_s15   ;;  %s777_s15 = sphi %s807_s15, %s1016_s15   ;;  %s773_s14 = sphi %s805_s14, %s1015_s14   ;;  %s769_s13 = sphi %s803_s13, %s1014_s13   ;;  %s765_s12 = sphi %s801_s12, %s1013_s12  }
   0x4   : > { %s826_s18 = sadd.s32 1, %s777_s15   ;;  %s91_s19 = sadd.s32 1, %s773_s14 }
   0x5   : > { %s88_s20 = ssub.s32 %s777_s15, %s826_s18  ;;  %p101_p0 = scmp.ne.s32.totalorder %s773_s14, %s769_s13 }
   0x6   : > { %p89_p1 = scmp.eq.s32.totalorder %s88_s20, 0  ;;  %p102_p2 = scmp.eq.s32.totalorder %s822_s16, 1 }
   0x7   : > { %p107_p3 = scmp.ne.s32.totalorder %s769_s13, %s765_s12  ;;  %p108_p4 = scmp.eq.s32.totalorder %s577_s17, 1 }
   0x8   : > { %s837_s21 = scalar_select %p89_p1, %s773_s14, %s91_s19  }
   0x9   : > { %p839_p5 = por %p102_p2, %p101_p0  ;;  %p843_p6 = por %p108_p4, %p107_p3 }
   0xa   : > { %p580_p7 = scmp.ge.s32.totalorder %s777_s15, 1  ;;  %p141_p8 = scmp.lt.s32.totalorder %s777_s15, 3 }
   0xc   : > { %p142_p9 = pnand %p580_p7, %p141_p8 }
   0xd   : > { %s582_s19 = sshll.u32 (!%p142_p9), %s822_s16, 3  ;;  %s605_s9 = sshll.u32 (!%p142_p9), %s822_s16, 6 }
   0xe   : > { %145 = sbr.rel (%p142_p9) target bundleno = 385 (0x181), region = 32  ;;  %p166_p10 = scmp.lt.s32.totalorder (!%p142_p9), %s582_s19, 15 }
   0xf   : > { %s511_s17 = scalar_lea.hbm (!%p142_p9), %s1010_s3, %s605_s9  ;;  %s735_s28 = scalar_lea.hbm (!%p142_p9), %s1010_s3, 128 }
  0x10   : > { %s514_s20 = sshll.u32 (!%p142_p9), %s511_s17, 4  ;;  %s515_s20 = int_to_ptr.hbm [resolvable:$true] %s514_s20 }
  0x13   : > { %v195_v0 = vld [vmem:[%s1008_s1 + $0x78] sm:$0xff]  ;;  %v194_v1 = vld [vmem:[%s1008_s1 + $0x70] sm:$0xff]  ;;  %v193_v2 = vld [vmem:[%s1008_s1 + $0x68] sm:$0xff]  ;;  %s1018_s19 = smov (!%p166_p10, %s582_s19), 15  ;;  %vm249_vm0 = vcmask 261120  }
  0x14   : > { %196 = vmatpush.msra.mxu0 %v195_v0  ;;  %606 = vmatpush.msra.mxu2 %v195_v0  ;;  %v192_v3 = vld [vmem:[%s1008_s1 + $0x60] sm:$0xff]  ;;  %v191_v4 = vld [vmem:[%s1008_s1 + $0x58] sm:$0xff]  ;;  %v190_v5 = vld [vmem:[%s1008_s1 + $0x50] sm:$0xff]  ;;  %s583_s6 = sshll.u32 %s1018_s19, 3  ;;  %s729_s19 = sshra.s32 %s515_s20, 4  ;;  %s730_s19 = int_to_ptr.hbm [resolvable:$true] %s729_s19 }
  0x15   : > { %607 = vmatpush.msra.mxu3 %v195_v0  ;;  %v189_v6 = vld [vmem:[%s1008_s1 + $0x48] sm:$0xff]  ;;  %v188_v7 = vld [vmem:[%s1008_s1 + $0x40] sm:$0xff]  ;;  %v187_v8 = vld [vmem:[%s1008_s1 + $0x38] sm:$0xff]  ;;  %s169_s26 = scalar_lea.vmem %s1007_s0, %s583_s6  ;;  %s162_s6 = sand.u32 1, %s769_s13  }
  0x16   : > { %197 = vmatpush.msra.mxu0 %v194_v1  ;;  %608 = vmatpush.msra.mxu2 %v194_v1  ;;  %v186_v9 = vld [vmem:[%s1008_s1 + $0x30] sm:$0xff]  ;;  %v185_v10 = vld [vmem:[%s1008_s1 + $0x28] sm:$0xff]  ;;  %v184_v11 = vld [vmem:[%s1008_s1 + $0x20] sm:$0xff]  ;;  %s581_s7 = sshll.u32 %s162_s6, 6  ;;  %s500_s24 = scalar_lea.sflag [#allocation3], %s162_s6 }
  0x17   : > { %609 = vmatpush.msra.mxu3 %v194_v1  ;;  %v183_v12 = vld [vmem:[%s1008_s1 + $0x18] sm:$0xff]  ;;  %v182_v13 = vld [vmem:[%s1008_s1 + $0x10] sm:$0xff]  ;;  %v181_v16 = vld [vmem:[%s1008_s1 + $0x8] sm:$0xff]  ;;  %s949_s8 = scalar_lea.vmem [#allocation2], %s581_s7  ;;  %s731_s25 = scalar_lea.hbm %s730_s19, 64 }
  0x18   : > { %198 = vmatpush.msra.mxu0 %v193_v2  ;;  %610 = vmatpush.msra.mxu2 %v193_v2  ;;  %v248_v14 = vld [vmem:[%s1009_s2 + $0x18] sm:$0xff]  ;;  %v247_v15 = vld [vmem:[%s1009_s2 + $0x10] sm:$0xff]  ;;  %v180_v17 = vld [vmem:[%s1008_s1] sm:$0xff]  ;;  %s512_s16 = sshll.u32 %s949_s8, 4  ;;  %p732_p11 = scmp.ne.s32.totalorder %s730_s19, %s731_s25  ;;  %s513_s16 = int_to_ptr.vmem [resolvable:$true] %s512_s16 }
  0x19   : > { %611 = vmatpush.msra.mxu3 %v193_v2  ;;  %286 = vmatpush.msra.mxu1 %v248_v14  ;;  %v907_v18 = vld [vmem:[%s169_s26] sm:$0xff]  ;;  %v909_v19 = vld [vmem:[%s169_s26 + $0x18] sm:$0xff]  ;;  %v916_v21 = vld [vmem:[%s169_s26 + $0x8] sm:$0xff]  ;;  %p736_p0 = scmp.lt.s32.totalorder %s730_s19, %s1010_s3  ;;  %p737_p1 = scmp.lt.s32.totalorder %s735_s28, %s731_s25 }
  0x1a   : > { %199 = vmatpush.msra.mxu0 %v192_v3  ;;  %612 = vmatpush.msra.mxu2 %v192_v3  ;;  %v911_v20 = vld [vmem:[%s169_s26 + $0x38] sm:$0xff]  ;;  %v918_v22 = vld [vmem:[%s169_s26 + $0x20] sm:$0xff]  ;;  %v922_v23 = vld [vmem:[%s169_s26 + $0x10] sm:$0xff]  ;;  %v323_v2 = vmul.f32 10.0, %v907_v18  ;;  %p733_p12 = pnand %p732_p11, %p839_p5 }
  0x1b   : > { %613 = vmatpush.msra.mxu3 %v192_v3  ;;  %287 = vmatpush.msra.mxu1 %v247_v15  ;;  %v924_v24 = vld [vmem:[%s169_s26 + $0x28] sm:$0xff]  ;;  %v928_v25 = vld [vmem:[%s169_s26 + $0x30] sm:$0xff]  ;;  %v245_v27 = vld [vmem:[%s1009_s2] sm:$0xff]  ;;  %p738_p2 = por %p737_p1, %p736_p0 }
  0x1c   : > { %200 = vmatpush.msra.mxu0 %v191_v4  ;;  %614 = vmatpush.msra.mxu2 %v191_v4  ;;  %v246_v26 = vld [vmem:[%s1009_s2 + $0x8] sm:$0xff]  ;;  %p734_p13 = pneg %p733_p12 }
  0x1d   : > { %615 = vmatpush.msra.mxu3 %v191_v4  ;;  %288 = vmatpush.msra.mxu1 %v246_v26 }
  0x1e   : > { %201 = vmatpush.msra.mxu0 %v190_v5  ;;  %616 = vmatpush.msra.mxu2 %v190_v5  ;;  %p739_p3 = pnand %p738_p2, %p734_p13 }
  0x1f   : > { %617 = vmatpush.msra.mxu3 %v190_v5  ;;  %289 = vmatpush.msra.mxu1 %v245_v27 }
  0x20   : > { %202 = vmatpush.msra.mxu0 %v189_v6  ;;  %618 = vmatpush.msra.mxu2 %v189_v6 }
  0x21   : > { %619 = vmatpush.msra.mxu3 %v189_v6 }
  0x22   : > { %203 = vmatpush.msra.mxu0 %v188_v7  ;;  %620 = vmatpush.msra.mxu2 %v188_v7 }
  0x23   : > { %621 = vmatpush.msra.mxu3 %v188_v7 }
  0x24   : > { %204 = vmatpush.msra.mxu0 %v187_v8  ;;  %622 = vmatpush.msra.mxu2 %v187_v8 }
  0x25   : > { %623 = vmatpush.msra.mxu3 %v187_v8 }
  0x26   : > { %205 = vmatpush.msra.mxu0 %v186_v9  ;;  %624 = vmatpush.msra.mxu2 %v186_v9 }
  0x27   : > { %625 = vmatpush.msra.mxu3 %v186_v9 }
  0x28   : > { %206 = vmatpush.msra.mxu0 %v185_v10  ;;  %626 = vmatpush.msra.mxu2 %v185_v10 }
  0x29   : > { %627 = vmatpush.msra.mxu3 %v185_v10 }
  0x2a   : > { %207 = vmatpush.msra.mxu0 %v184_v11  ;;  %628 = vmatpush.msra.mxu2 %v184_v11 }
  0x2b   : > { %629 = vmatpush.msra.mxu3 %v184_v11 }
  0x2c   : > { %208 = vmatpush.msra.mxu0 %v183_v12  ;;  %630 = vmatpush.msra.mxu2 %v183_v12 }
  0x2d   : > { %631 = vmatpush.msra.mxu3 %v183_v12 }
  0x2e   : > { %209 = vmatpush.msra.mxu0 %v182_v13  ;;  %632 = vmatpush.msra.mxu2 %v182_v13 }
  0x2f   : > { %633 = vmatpush.msra.mxu3 %v182_v13 }
  0x30   : > { %210 = vmatpush.msra.mxu0 %v181_v16  ;;  %634 = vmatpush.msra.mxu2 %v181_v16 }
  0x31   : > { %635 = vmatpush.msra.mxu3 %v181_v16 }
  0x32   : > { %211 = vmatpush.msra.mxu0 %v180_v17  ;;  %636 = vmatpush.msra.mxu2 %v180_v17 }
  0x33   : > { %212 = vmatmul.f32.vlgmr.msra.gmra.mxu0 %v907_v18  ;;  %221 = vmatmul.f32.vlgmr.msra.gmra.mxu2 %v909_v19 }
  0x34   : > { %637 = vmatpush.msra.mxu3 %v180_v17 }
  0x35   : > { %233 = vmatmul.f32.vlgmr.msra.gmra.mxu3 %v911_v20 }
  0x36   : > { %638 = vmatpush.msrb.mxu3 %v248_v14 }
  0x38   : > { %639 = vmatpush.msrb.mxu3 %v247_v15 }
  0x3a   : > { %640 = vmatpush.msrb.mxu3 %v246_v26  ;;  %v324_v26 = vmul.f32 10.0, %v916_v21 }
  0x3b   : > { %215 = vmatmul.f32.gmra.mxu0 %v916_v21  ;;  %224 = vmatmul.f32.gmra.mxu2 %v918_v22 }
  0x3c   : > { %641 = vmatpush.msrb.mxu3 %v245_v27 }
  0x43   : > { %218 = vmatmul.f32.gmra.mxu0 %v922_v23  ;;  %227 = vmatmul.f32.gmra.mxu2 %v924_v24 }
  0x4b   : > { %230 = vmatmul.f32.gmra.mxu2 %v928_v25 }
  0xb0   : > { %v213_v28 = vpop.f32.mrf.mxu0 }
  0xb1   : > { %v237_v29 = vmax.f32 %v213_v28, 0.0 }
  0xb3   : > { %584 = vmatmul.msk.f32.vlgmr.msra.gmra.mxu1 %vm249_vm0, %v237_v29 }
  0xb6   : > { %v222_v30 = vpop.f32.mrf.mxu2 }
  0xb7   : > { %v240_v37 = vmax.f32 %v222_v30, 0.0 }
  0xb8   : > { %v216_v31 = vpop.f32.mrf.mxu0  ;;  %v234_v41 = vpop.f32.mrf.mxu3 }
  0xb9   : > { %v238_v32 = vmax.f32 %v216_v31, 0.0  ;;  %v244_v42 = vmax.f32 %v234_v41, 0.0 }
  0xbb   : > { %585 = vmatmul.msk.f32.gmra.mxu1 %vm249_vm0, %v238_v32 }
  0xbe   : > { %v225_v33 = vpop.f32.mrf.mxu2 }
  0xbf   : > { %v241_v40 = vmax.f32 %v225_v33, 0.0 }
  0xc0   : > { %v219_v34 = vpop.f32.mrf.mxu0 }
  0xc1   : > { %v239_v35 = vmax.f32 %v219_v34, 0.0 }
  0xc3   : > { %586 = vmatmul.msk.f32.gmra.mxu1 %vm249_vm0, %v239_v35 }
  0xc6   : > { %v228_v36 = vpop.f32.mrf.mxu2 }
  0xc7   : > { %v242_v43 = vmax.f32 %v228_v36, 0.0 }
  0xcb   : > { %587 = vmatmul.msk.f32.gmra.mxu1 %vm249_vm0, %v240_v37 }
  0xce   : > { %v231_v38 = vpop.f32.mrf.mxu2 }
  0xcf   : > { %v243_v39 = vmax.f32 %v231_v38, 0.0 }
  0xd1   : > { %590 = vmatmul.msk.f32.vlgmr.msrb.gmra.mxu3 %vm249_vm0, %v243_v39 }
  0xd3   : > { %588 = vmatmul.msk.f32.gmra.mxu1 %vm249_vm0, %v241_v40 }
  0xd9   : > { %591 = vmatmul.msk.f32.gmra.mxu3 %vm249_vm0, %v244_v42 }
  0xdb   : > { %589 = vmatmul.msk.f32.gmra.mxu1 %vm249_vm0, %v242_v43 }
 0x130   : > { %v291_v44 = vpop.f32.mrf.mxu1 }
 0x131   : > { %v315_v45 = vmax.f32 %v291_v44, 0.0  ;;  %v325_v44 = vmul.f32 10.0, %v922_v23 }
 0x133   : > { %v592_v46 = vmul.f32 -1.442695, %v315_v45 }
 0x135   : > { %683 = vpow2.f32 %v592_v46 }
 0x138   : > { %v294_v47 = vpop.f32.mrf.mxu1 }
 0x139   : > { %v316_v48 = vmax.f32 %v294_v47, 0.0 }
 0x13b   : > { %v684_v49 = vpop.eup %683  ;;  %v593_v50 = vmul.f32 -1.442695, %v316_v48 }
 0x13c   : > { %v355_v51 = vadd.f32 1.0, %v684_v49 }
 0x13d   : > { %685 = vpow2.f32 %v593_v50 }
 0x13e   : > { %687 = vrcp.f32 %v355_v51  ;;  %v374_v60 = vand.u32 2147483648, %v355_v51  ;;  %v372_v63 = vand.u32 2147483647, %v355_v51  ;;  %vm368_vm2 = vweird.f32 %v355_v51 }
 0x140   : > { %v297_v52 = vpop.f32.mrf.mxu1  ;;  %v375_v6 = vor.u32 1.1754944e-38, %v374_v60  ;;  %vm373_vm4 = vcmp.eq.f32.partialorder %v372_v63, 8.507059e+37 }
 0x141   : > { %v317_v53 = vmax.f32 %v297_v52, 0.0 }
 0x143   : > { %v686_v54 = vpop.eup %685  ;;  %v594_v55 = vmul.f32 -1.442695, %v317_v53 }
 0x144   : > { %v688_v56 = vpop.eup %687  ;;  %v356_v57 = vadd.f32 1.0, %v686_v54 }
 0x145   : > { %v364_v58 = vmul.f32 %v688_v56, %v355_v51  ;;  %689 = vpow2.f32 %v594_v55  ;;  %vm369_vm1 = vweird.f32 %v688_v56 }
 0x146   : > { %691 = vrcp.f32 %v356_v57  ;;  %vm370_vm3 = vmor %vm368_vm2, %vm369_vm1  ;;  %v389_v13 = vand.u32 2147483648, %v356_v57  ;;  %v387_v16 = vand.u32 2147483647, %v356_v57  ;;  %vm383_vm6 = vweird.f32 %v356_v57 }
 0x147   : > { %v365_v59 = vsub.f32 1.0, %v364_v58 }
 0x148   : > { %v300_v61 = vpop.f32.mrf.mxu1  ;;  %v390_v30 = vor.u32 1.1754944e-38, %v389_v13  ;;  %vm388_vm8 = vcmp.eq.f32.partialorder %v387_v16, 8.507059e+37 }
 0x149   : > { %v366_v62 = vmul.f32 %v688_v56, %v365_v59  ;;  %v318_v0 = vmax.f32 %v300_v61, 0.0 }
 0x14b   : > { %v690_v1 = vpop.eup %689  ;;  %v367_v3 = vadd.f32 %v688_v56, %v366_v62  ;;  %v595_v4 = vmul.f32 -1.442695, %v318_v0  ;;  %v326_v0 = vmul.f32 10.0, %v909_v19 }
 0x14c   : > { %v692_v5 = vpop.eup %691  ;;  %v357_v7 = vadd.f32 1.0, %v690_v1 }
 0x14d   : > { %v371_v8 = vsel %vm370_vm3, %v688_v56, %v367_v3  ;;  %v379_v9 = vmul.f32 %v692_v5, %v356_v57  ;;  %693 = vpow2.f32 %v595_v4  ;;  %vm384_vm5 = vweird.f32 %v692_v5 }
 0x14e   : > { %v376_v10 = vsel %vm373_vm4, %v375_v6, %v371_v8  ;;  %695 = vrcp.f32 %v357_v7  ;;  %vm385_vm7 = vmor %vm383_vm6, %vm384_vm5  ;;  %v402_v39 = vand.u32 2147483647, %v357_v7  ;;  %v404_v21 = vand.u32 2147483648, %v357_v7 }
 0x14f   : > { %v483_v11 = vmul.f32 %v376_v10, %v323_v2  ;;  %v380_v12 = vsub.f32 1.0, %v379_v9  ;;  %vm398_vm10 = vweird.f32 %v357_v7 }
 0x150   : > { %v303_v14 = vpop.f32.mrf.mxu1  ;;  %v405_v49 = vor.u32 1.1754944e-38, %v404_v21  ;;  %vm403_vm12 = vcmp.eq.f32.partialorder %v402_v39, 8.507059e+37 }
 0x151   : > { %491 = vst [vmem:[%s949_s8] sm:$0xff] %v483_v11  ;;  %v381_v15 = vmul.f32 %v692_v5, %v380_v12  ;;  %v319_v17 = vmax.f32 %v303_v14, 0.0 }
 0x153   : > { %v694_v18 = vpop.eup %693  ;;  %v382_v27 = vadd.f32 %v692_v5, %v381_v15  ;;  %v596_v28 = vmul.f32 -1.442695, %v319_v17  ;;  %v327_v15 = vmul.f32 10.0, %v918_v22 }
 0x154   : > { %v696_v29 = vpop.eup %695  ;;  %v358_v31 = vadd.f32 1.0, %v694_v18  ;;  %v309_v32 = vpop.f32.mrf.mxu3 }
 0x155   : > { %v386_v33 = vsel %vm385_vm7, %v692_v5, %v382_v27  ;;  %v394_v34 = vmul.f32 %v696_v29, %v357_v7  ;;  %697 = vpow2.f32 %v596_v28  ;;  %v321_v38 = vmax.f32 %v309_v32, 0.0 }
 0x156   : > { %v391_v35 = vsel %vm388_vm8, %v390_v30, %v386_v33  ;;  %699 = vrcp.f32 %v358_v31  ;;  %vm399_vm9 = vweird.f32 %v696_v29  ;;  %v419_v57 = vand.u32 2147483648, %v358_v31 }
 0x157   : > { %v484_v36 = vmul.f32 %v391_v35, %v324_v26  ;;  %v395_v37 = vsub.f32 1.0, %v394_v34  ;;  %v598_v42 = vmul.f32 -1.442695, %v321_v38  ;;  %vm400_vm11 = vmor %vm398_vm10, %vm399_vm9  ;;  %v417_v60 = vand.u32 2147483647, %v358_v31 }
 0x158   : > { %v306_v40 = vpop.f32.mrf.mxu1  ;;  %vm413_vm14 = vweird.f32 %v358_v31  ;;  %v420_v3 = vor.u32 1.1754944e-38, %v419_v57  ;;  %v329_v35 = vmul.f32 10.0, %v928_v25 }
 0x159   : > { %492 = vst [vmem:[%s949_s8 + $0x8] sm:$0xff] %v484_v36  ;;  %v396_v41 = vmul.f32 %v696_v29, %v395_v37  ;;  %v320_v43 = vmax.f32 %v306_v40, 0.0  ;;  %701 = vpow2.f32 %v598_v42  ;;  %vm418_vm0 = vcmp.eq.f32.partialorder %v417_v60, 8.507059e+37 }
 0x15b   : > { %v698_v45 = vpop.eup %697  ;;  %v397_v46 = vadd.f32 %v696_v29, %v396_v41  ;;  %v597_v47 = vmul.f32 -1.442695, %v320_v43  ;;  %v328_v43 = vmul.f32 10.0, %v924_v24 }
 0x15c   : > { %v700_v48 = vpop.eup %699  ;;  %v359_v50 = vadd.f32 1.0, %v698_v45  ;;  %v312_v51 = vpop.f32.mrf.mxu3 }
 0x15d   : > { %v401_v52 = vsel %vm400_vm11, %v696_v29, %v397_v46  ;;  %v409_v53 = vmul.f32 %v700_v48, %v358_v31  ;;  %703 = vpow2.f32 %v597_v47  ;;  %v322_v23 = vmax.f32 %v312_v51, 0.0 }
 0x15e   : > { %v406_v54 = vsel %vm403_vm12, %v405_v49, %v401_v52  ;;  %705 = vrcp.f32 %v359_v50  ;;  %vm414_vm13 = vweird.f32 %v700_v48  ;;  %v434_v10 = vand.u32 2147483648, %v359_v50 }
 0x15f   : > { %v485_v55 = vmul.f32 %v406_v54, %v325_v44  ;;  %v410_v56 = vsub.f32 1.0, %v409_v53  ;;  %v702_v58 = vpop.eup %701  ;;  %v599_v61 = vmul.f32 -1.442695, %v322_v23  ;;  %vm415_vm15 = vmor %vm413_vm14, %vm414_vm13  ;;  %v432_v12 = vand.u32 2147483647, %v359_v50 }
 0x160   : > { %v361_v62 = vadd.f32 1.0, %v702_v58  ;;  %vm428_vm2 = vweird.f32 %v359_v50  ;;  %v435_v18 = vor.u32 1.1754944e-38, %v434_v10  ;;  %v330_v53 = vmul.f32 10.0, %v911_v20 }
 0x161   : > { %493 = vst [vmem:[%s949_s8 + $0x10] sm:$0xff] %v485_v55  ;;  %v411_v59 = vmul.f32 %v700_v48, %v410_v56  ;;  %707 = vpow2.f32 %v599_v61  ;;  %vm433_vm4 = vcmp.eq.f32.partialorder %v432_v12, 8.507059e+37 }
 0x162   : > { %709 = vrcp.f32 %v361_v62  ;;  %v464_v30 = vand.u32 2147483648, %v361_v62  ;;  %v462_v34 = vand.u32 2147483647, %v361_v62  ;;  %vm458_vm6 = vweird.f32 %v361_v62 }
 0x163   : > { %v704_v63 = vpop.eup %703  ;;  %v412_v1 = vadd.f32 %v700_v48, %v411_v59 }
 0x164   : > { %v706_v2 = vpop.eup %705  ;;  %v360_v6 = vadd.f32 1.0, %v704_v63  ;;  %v465_v39 = vor.u32 1.1754944e-38, %v464_v30  ;;  %vm463_vm9 = vcmp.eq.f32.partialorder %v462_v34, 8.507059e+37 }
 0x165   : > { %v416_v4 = vsel %vm415_vm15, %v700_v48, %v412_v1  ;;  %v424_v5 = vmul.f32 %v706_v2, %v359_v50  ;;  %vm429_vm1 = vweird.f32 %v706_v2 }
 0x166   : > { %v421_v7 = vsel %vm418_vm0, %v420_v3, %v416_v4  ;;  %711 = vrcp.f32 %v360_v6  ;;  %vm430_vm3 = vmor %vm428_vm2, %vm429_vm1  ;;  %v449_v37 = vand.u32 2147483648, %v360_v6  ;;  %v447_v40 = vand.u32 2147483647, %v360_v6 }
 0x167   : > { %v486_v8 = vmul.f32 %v421_v7, %v326_v0  ;;  %v425_v9 = vsub.f32 1.0, %v424_v5  ;;  %v708_v11 = vpop.eup %707  ;;  %vm443_vm10 = vweird.f32 %v360_v6 }
 0x168   : > { %v710_v13 = vpop.eup %709  ;;  %v958_v14 = vadd.f32 1.0, %v708_v11  ;;  %v450_v46 = vor.u32 1.1754944e-38, %v449_v37  ;;  %vm448_vm12 = vcmp.eq.f32.partialorder %v447_v40, 8.507059e+37 }
 0x169   : > { %494 = vst [vmem:[%s949_s8 + $0x18] sm:$0xff] %v486_v8  ;;  %v426_v19 = vmul.f32 %v706_v2, %v425_v9  ;;  %v454_v17 = vmul.f32 %v710_v13, %v361_v62  ;;  %vm459_vm5 = vweird.f32 %v710_v13 }
 0x16a   : > { %713 = vrcp.f32 %v958_v14  ;;  %vm460_vm7 = vmor %vm458_vm6, %vm459_vm5  ;;  %v479_v49 = vand.u32 2147483648, %v958_v14  ;;  %v477_v51 = vand.u32 2147483647, %v958_v14  ;;  %vm473_vm14 = vweird.f32 %v958_v14 }
 0x16b   : > { %v427_v16 = vadd.f32 %v706_v2, %v426_v19  ;;  %v455_v28 = vsub.f32 1.0, %v454_v17 }
 0x16c   : > { %v712_v26 = vpop.eup %711  ;;  %v480_v55 = vor.u32 1.1754944e-38, %v479_v49  ;;  %vm478_vm0 = vcmp.eq.f32.partialorder %v477_v51, 8.507059e+37 }
 0x16d   : > { %v431_v27 = vsel %vm430_vm3, %v706_v2, %v427_v16  ;;  %v439_v31 = vmul.f32 %v712_v26, %v360_v6  ;;  %v456_v33 = vmul.f32 %v710_v13, %v455_v28  ;;  %vm444_vm8 = vweird.f32 %v712_v26 }
 0x16e   : > { %v436_v29 = vsel %vm433_vm4, %v435_v18, %v431_v27  ;;  %vm445_vm11 = vmor %vm443_vm10, %vm444_vm8 }
 0x16f   : > { %v487_v32 = vmul.f32 %v436_v29, %v327_v15  ;;  %v440_v22 = vsub.f32 1.0, %v439_v31  ;;  %v457_v36 = vadd.f32 %v710_v13, %v456_v33 }
 0x170   : > { %v714_v38 = vpop.eup %713 }
 0x171   : > { %495 = vst [vmem:[%s949_s8 + $0x20] sm:$0xff] %v487_v32  ;;  %v441_v21 = vmul.f32 %v712_v26, %v440_v22  ;;  %v461_v41 = vsel %vm460_vm7, %v710_v13, %v457_v36  ;;  %v469_v42 = vmul.f32 %v714_v38, %v958_v14  ;;  %vm474_vm13 = vweird.f32 %v714_v38 }
 0x172   : > { %v466_v44 = vsel %vm463_vm9, %v465_v39, %v461_v41  ;;  %vm475_vm15 = vmor %vm473_vm14, %vm474_vm13 }
 0x173   : > { %v442_v25 = vadd.f32 %v712_v26, %v441_v21  ;;  %v489_v45 = vmul.f32 %v466_v44, %v329_v35  ;;  %v470_v47 = vsub.f32 1.0, %v469_v42 }
 0x175   : > { %v446_v48 = vsel %vm445_vm11, %v712_v26, %v442_v25  ;;  %497 = vst [vmem:[%s949_s8 + $0x30] sm:$0xff] %v489_v45  ;;  %v471_v24 = vmul.f32 %v714_v38, %v470_v47 }
 0x176   : > { %v451_v50 = vsel %vm448_vm12, %v450_v46, %v446_v48 }
 0x177   : > { %v488_v52 = vmul.f32 %v451_v50, %v328_v43  ;;  %v472_v54 = vadd.f32 %v714_v38, %v471_v24 }
 0x179   : > { %496 = vst [vmem:[%s949_s8 + $0x28] sm:$0xff] %v488_v52  ;;  %v476_v56 = vsel %vm475_vm15, %v714_v38, %v472_v54 }
 0x17a   : > { %v481_v23 = vsel %vm478_vm0, %v480_v55, %v476_v56 }
 0x17b   : > { %v490_v57 = vmul.f32 %v481_v23, %v330_v53 }
 0x17d   : > { %498 = vst [vmem:[%s949_s8 + $0x38] sm:$0xff] %v490_v57 }
 0x17e   : > { %742 = shalt.err (!%p739_p3)
}
 0x17f   : > { %s779_s4 = smov 128   ;;  %s780_s5 = smov 8  }
 0x180   : > { %642 = dma.vmem_to_hbm [thread:$0]  (%p839_p5), %s513_s16, 1024, %s515_s20, %s500_s24, %s779_s4, %s779_s4, %s780_s5  }
 0x181 PF: > { %p648_p4 = scmp.ge.s32.totalorder %s777_s15, 2  ;;  %s529_s6 = sand.u32 1, %s765_s12  }
 0x182   : > { %s530_s7 = scalar_lea.sflag [#allocation3], %s529_s6 }
 0x183   : > { %p645_p7 = pnand %p648_p4, %p843_p6 }
 0x185   : > { %p646_p8 = pneg %p645_p7 }
 0x187   : > { %760 = dma.done.wait (%p646_p8), %s530_s7, 1024  }
 0x188   : > { %762 = vsyncadd (%p646_p8), %s530_s7, 4294966272  ;;  %p13_p9 = scmp.ge.s32.totalorder %s826_s18, 4   ;;  %s1013_s12 = smov %s769_s13 }
 0x189   : > { %s1014_s13 = smov %s773_s14  ;;  %s1015_s14 = smov %s837_s21 }
 0x18a   : > { %s1016_s15 = smov %s826_s18  ;;  %15 = sbr.rel (!%p13_p9) target bundleno = 3 (0x3), region = 67 }
 0x18f   :  { %536 = vsyncpa [#allocation3], 1 }
 0x190   :  { %538 = vsyncpa [#allocation3 + $0x1], 1 }

// kernel: tpu_custom_call.1
= control target key start
LH: loop header
LB: loop body
LE: loop exit
PB: predicated region body
PF: predicated region fallthrough
CT: control target
= control target key end

     0   :  { %8 = vsyncpa [#allocation3], 0  ;;  %s1007_s0 = inlined_call_operand.vmem [shape: f32[128,128], index: 0, kind: input, shape index: {}]   ;;  %s1008_s1 = inlined_call_operand.vmem [shape: f32[128,32], index: 1, kind: input, shape index: {}]   ;;  %s1009_s2 = inlined_call_operand.vmem [shape: f32[32,128], index: 2, kind: input, shape index: {}]   ;;  %s1010_s3 = inlined_call_operand.hbm [shape: f32[128,128], index: 3, kind: output, shape index: {}]  }
   0x1   :  { %10 = vsyncpa [#allocation3 + $0x1], 0  ;;  %s801_s12 = smov 0   ;;  %s803_s13 = smov 0  }
   0x2   :  { %s805_s14 = smov 0   ;;  %s807_s15 = smov 0  }
   0x3 LB: > { %s822_s16 = sadd.s32 4294967295, %s777_s15   ;;  %s577_s17 = sadd.s32 4294967294, %s777_s15   ;;  %s777_s15 = sphi %s807_s15, %s1016_s15   ;;  %s773_s14 = sphi %s805_s14, %s1015_s14   ;;  %s769_s13 = sphi %s803_s13, %s1014_s13   ;;  %s765_s12 = sphi %s801_s12, %s1013_s12  }
   0x4   : > { %s826_s18 = sadd.s32 1, %s777_s15   ;;  %s91_s19 = sadd.s32 1, %s773_s14 }
   0x5   : > { %s88_s20 = ssub.s32 %s777_s15, %s826_s18  ;;  %p101_p0 = scmp.ne.s32.totalorder %s773_s14, %s769_s13 }
   0x6   : > { %p89_p1 = scmp.eq.s32.totalorder %s88_s20, 0  ;;  %p102_p2 = scmp.eq.s32.totalorder %s822_s16, 1 }
   0x7   : > { %p107_p3 = scmp.ne.s32.totalorder %s769_s13, %s765_s12  ;;  %p108_p4 = scmp.eq.s32.totalorder %s577_s17, 1 }
   0x8   : > { %s837_s21 = scalar_select %p89_p1, %s773_s14, %s91_s19  }
   0x9   : > { %p839_p5 = por %p102_p2, %p101_p0  ;;  %p843_p6 = por %p108_p4, %p107_p3 }
   0xa   : > { %p580_p7 = scmp.ge.s32.totalorder %s777_s15, 1  ;;  %p141_p8 = scmp.lt.s32.totalorder %s777_s15, 3 }
   0xc   : > { %p142_p9 = pnand %p580_p7, %p141_p8 }
   0xd   : > { %s582_s19 = sshll.u32 (!%p142_p9), %s822_s16, 3  ;;  %s605_s9 = sshll.u32 (!%p142_p9), %s822_s16, 6 }
   0xe   : > { %145 = sbr.rel (%p142_p9) target bundleno = 385 (0x181), region = 32  ;;  %p166_p10 = scmp.lt.s32.totalorder (!%p142_p9), %s582_s19, 15 }
   0xf   : > { %s511_s17 = scalar_lea.hbm (!%p142_p9), %s1010_s3, %s605_s9  ;;  %s735_s28 = scalar_lea.hbm (!%p142_p9), %s1010_s3, 128 }
  0x10   : > { %s514_s20 = sshll.u32 (!%p142_p9), %s511_s17, 4  ;;  %s515_s20 = int_to_ptr.hbm [resolvable:$true] %s514_s20 }
  0x13   : > { %v195_v0 = vld [vmem:[%s1008_s1 + $0x78] sm:$0xff]  ;;  %v194_v1 = vld [vmem:[%s1008_s1 + $0x70] sm:$0xff]  ;;  %v193_v2 = vld [vmem:[%s1008_s1 + $0x68] sm:$0xff]  ;;  %s1018_s19 = smov (!%p166_p10, %s582_s19), 15  ;;  %vm249_vm0 = vcmask 261120  }
  0x14   : > { %196 = vmatpush.msra.mxu0 %v195_v0  ;;  %606 = vmatpush.msra.mxu2 %v195_v0  ;;  %v192_v3 = vld [vmem:[%s1008_s1 + $0x60] sm:$0xff]  ;;  %v191_v4 = vld [vmem:[%s1008_s1 + $0x58] sm:$0xff]  ;;  %v190_v5 = vld [vmem:[%s1008_s1 + $0x50] sm:$0xff]  ;;  %s583_s6 = sshll.u32 %s1018_s19, 3  ;;  %s729_s19 = sshra.s32 %s515_s20, 4  ;;  %s730_s19 = int_to_ptr.hbm [resolvable:$true] %s729_s19 }
  0x15   : > { %607 = vmatpush.msra.mxu3 %v195_v0  ;;  %v189_v6 = vld [vmem:[%s1008_s1 + $0x48] sm:$0xff]  ;;  %v188_v7 = vld [vmem:[%s1008_s1 + $0x40] sm:$0xff]  ;;  %v187_v8 = vld [vmem:[%s1008_s1 + $0x38] sm:$0xff]  ;;  %s169_s26 = scalar_lea.vmem %s1007_s0, %s583_s6  ;;  %s162_s6 = sand.u32 1, %s769_s13  }
  0x16   : > { %197 = vmatpush.msra.mxu0 %v194_v1  ;;  %608 = vmatpush.msra.mxu2 %v194_v1  ;;  %v186_v9 = vld [vmem:[%s1008_s1 + $0x30] sm:$0xff]  ;;  %v185_v10 = vld [vmem:[%s1008_s1 + $0x28] sm:$0xff]  ;;  %v184_v11 = vld [vmem:[%s1008_s1 + $0x20] sm:$0xff]  ;;  %s581_s7 = sshll.u32 %s162_s6, 6  ;;  %s500_s24 = scalar_lea.sflag [#allocation3], %s162_s6 }
  0x17   : > { %609 = vmatpush.msra.mxu3 %v194_v1  ;;  %v183_v12 = vld [vmem:[%s1008_s1 + $0x18] sm:$0xff]  ;;  %v182_v13 = vld [vmem:[%s1008_s1 + $0x10] sm:$0xff]  ;;  %v181_v16 = vld [vmem:[%s1008_s1 + $0x8] sm:$0xff]  ;;  %s949_s8 = scalar_lea.vmem [#allocation2], %s581_s7  ;;  %s731_s25 = scalar_lea.hbm %s730_s19, 64 }
  0x18   : > { %198 = vmatpush.msra.mxu0 %v193_v2  ;;  %610 = vmatpush.msra.mxu2 %v193_v2  ;;  %v248_v14 = vld [vmem:[%s1009_s2 + $0x18] sm:$0xff]  ;;  %v247_v15 = vld [vmem:[%s1009_s2 + $0x10] sm:$0xff]  ;;  %v180_v17 = vld [vmem:[%s1008_s1] sm:$0xff]  ;;  %s512_s16 = sshll.u32 %s949_s8, 4  ;;  %p732_p11 = scmp.ne.s32.totalorder %s730_s19, %s731_s25  ;;  %s513_s16 = int_to_ptr.vmem [resolvable:$true] %s512_s16 }
  0x19   : > { %611 = vmatpush.msra.mxu3 %v193_v2  ;;  %286 = vmatpush.msra.mxu1 %v248_v14  ;;  %v907_v18 = vld [vmem:[%s169_s26] sm:$0xff]  ;;  %v909_v19 = vld [vmem:[%s169_s26 + $0x18] sm:$0xff]  ;;  %v916_v21 = vld [vmem:[%s169_s26 + $0x8] sm:$0xff]  ;;  %p736_p0 = scmp.lt.s32.totalorder %s730_s19, %s1010_s3  ;;  %p737_p1 = scmp.lt.s32.totalorder %s735_s28, %s731_s25 }
  0x1a   : > { %199 = vmatpush.msra.mxu0 %v192_v3  ;;  %612 = vmatpush.msra.mxu2 %v192_v3  ;;  %v911_v20 = vld [vmem:[%s169_s26 + $0x38] sm:$0xff]  ;;  %v918_v22 = vld [vmem:[%s169_s26 + $0x20] sm:$0xff]  ;;  %v922_v23 = vld [vmem:[%s169_s26 + $0x10] sm:$0xff]  ;;  %v323_v2 = vmul.f32 10.0, %v907_v18  ;;  %p733_p12 = pnand %p732_p11, %p839_p5 }
  0x1b   : > { %613 = vmatpush.msra.mxu3 %v192_v3  ;;  %287 = vmatpush.msra.mxu1 %v247_v15  ;;  %v924_v24 = vld [vmem:[%s169_s26 + $0x28] sm:$0xff]  ;;  %v928_v25 = vld [vmem:[%s169_s26 + $0x30] sm:$0xff]  ;;  %v245_v27 = vld [vmem:[%s1009_s2] sm:$0xff]  ;;  %p738_p2 = por %p737_p1, %p736_p0 }
  0x1c   : > { %200 = vmatpush.msra.mxu0 %v191_v4  ;;  %614 = vmatpush.msra.mxu2 %v191_v4  ;;  %v246_v26 = vld [vmem:[%s1009_s2 + $0x8] sm:$0xff]  ;;  %p734_p13 = pneg %p733_p12 }
  0x1d   : > { %615 = vmatpush.msra.mxu3 %v191_v4  ;;  %288 = vmatpush.msra.mxu1 %v246_v26 }
  0x1e   : > { %201 = vmatpush.msra.mxu0 %v190_v5  ;;  %616 = vmatpush.msra.mxu2 %v190_v5  ;;  %p739_p3 = pnand %p738_p2, %p734_p13 }
  0x1f   : > { %617 = vmatpush.msra.mxu3 %v190_v5  ;;  %289 = vmatpush.msra.mxu1 %v245_v27 }
  0x20   : > { %202 = vmatpush.msra.mxu0 %v189_v6  ;;  %618 = vmatpush.msra.mxu2 %v189_v6 }
  0x21   : > { %619 = vmatpush.msra.mxu3 %v189_v6 }
  0x22   : > { %203 = vmatpush.msra.mxu0 %v188_v7  ;;  %620 = vmatpush.msra.mxu2 %v188_v7 }
  0x23   : > { %621 = vmatpush.msra.mxu3 %v188_v7 }
  0x24   : > { %204 = vmatpush.msra.mxu0 %v187_v8  ;;  %622 = vmatpush.msra.mxu2 %v187_v8 }
  0x25   : > { %623 = vmatpush.msra.mxu3 %v187_v8 }
  0x26   : > { %205 = vmatpush.msra.mxu0 %v186_v9  ;;  %624 = vmatpush.msra.mxu2 %v186_v9 }
  0x27   : > { %625 = vmatpush.msra.mxu3 %v186_v9 }
  0x28   : > { %206 = vmatpush.msra.mxu0 %v185_v10  ;;  %626 = vmatpush.msra.mxu2 %v185_v10 }
  0x29   : > { %627 = vmatpush.msra.mxu3 %v185_v10 }
  0x2a   : > { %207 = vmatpush.msra.mxu0 %v184_v11  ;;  %628 = vmatpush.msra.mxu2 %v184_v11 }
  0x2b   : > { %629 = vmatpush.msra.mxu3 %v184_v11 }
  0x2c   : > { %208 = vmatpush.msra.mxu0 %v183_v12  ;;  %630 = vmatpush.msra.mxu2 %v183_v12 }
  0x2d   : > { %631 = vmatpush.msra.mxu3 %v183_v12 }
  0x2e   : > { %209 = vmatpush.msra.mxu0 %v182_v13  ;;  %632 = vmatpush.msra.mxu2 %v182_v13 }
  0x2f   : > { %633 = vmatpush.msra.mxu3 %v182_v13 }
  0x30   : > { %210 = vmatpush.msra.mxu0 %v181_v16  ;;  %634 = vmatpush.msra.mxu2 %v181_v16 }
  0x31   : > { %635 = vmatpush.msra.mxu3 %v181_v16 }
  0x32   : > { %211 = vmatpush.msra.mxu0 %v180_v17  ;;  %636 = vmatpush.msra.mxu2 %v180_v17 }
  0x33   : > { %212 = vmatmul.f32.vlgmr.msra.gmra.mxu0 %v907_v18  ;;  %221 = vmatmul.f32.vlgmr.msra.gmra.mxu2 %v909_v19 }
  0x34   : > { %637 = vmatpush.msra.mxu3 %v180_v17 }
  0x35   : > { %233 = vmatmul.f32.vlgmr.msra.gmra.mxu3 %v911_v20 }
  0x36   : > { %638 = vmatpush.msrb.mxu3 %v248_v14 }
  0x38   : > { %639 = vmatpush.msrb.mxu3 %v247_v15 }
  0x3a   : > { %640 = vmatpush.msrb.mxu3 %v246_v26  ;;  %v324_v26 = vmul.f32 10.0, %v916_v21 }
  0x3b   : > { %215 = vmatmul.f32.gmra.mxu0 %v916_v21  ;;  %224 = vmatmul.f32.gmra.mxu2 %v918_v22 }
  0x3c   : > { %641 = vmatpush.msrb.mxu3 %v245_v27 }
  0x43   : > { %218 = vmatmul.f32.gmra.mxu0 %v922_v23  ;;  %227 = vmatmul.f32.gmra.mxu2 %v924_v24 }
  0x4b   : > { %230 = vmatmul.f32.gmra.mxu2 %v928_v25 }
  0xb0   : > { %v213_v28 = vpop.f32.mrf.mxu0 }
  0xb1   : > { %v237_v29 = vmax.f32 %v213_v28, 0.0 }
  0xb3   : > { %584 = vmatmul.msk.f32.vlgmr.msra.gmra.mxu1 %vm249_vm0, %v237_v29 }
  0xb6   : > { %v222_v30 = vpop.f32.mrf.mxu2 }
  0xb7   : > { %v240_v37 = vmax.f32 %v222_v30, 0.0 }
  0xb8   : > { %v216_v31 = vpop.f32.mrf.mxu0  ;;  %v234_v41 = vpop.f32.mrf.mxu3 }
  0xb9   : > { %v238_v32 = vmax.f32 %v216_v31, 0.0  ;;  %v244_v42 = vmax.f32 %v234_v41, 0.0 }
  0xbb   : > { %585 = vmatmul.msk.f32.gmra.mxu1 %vm249_vm0, %v238_v32 }
  0xbe   : > { %v225_v33 = vpop.f32.mrf.mxu2 }
  0xbf   : > { %v241_v40 = vmax.f32 %v225_v33, 0.0 }
  0xc0   : > { %v219_v34 = vpop.f32.mrf.mxu0 }
  0xc1   : > { %v239_v35 = vmax.f32 %v219_v34, 0.0 }
  0xc3   : > { %586 = vmatmul.msk.f32.gmra.mxu1 %vm249_vm0, %v239_v35 }
  0xc6   : > { %v228_v36 = vpop.f32.mrf.mxu2 }
  0xc7   : > { %v242_v43 = vmax.f32 %v228_v36, 0.0 }
  0xcb   : > { %587 = vmatmul.msk.f32.gmra.mxu1 %vm249_vm0, %v240_v37 }
  0xce   : > { %v231_v38 = vpop.f32.mrf.mxu2 }
  0xcf   : > { %v243_v39 = vmax.f32 %v231_v38, 0.0 }
  0xd1   : > { %590 = vmatmul.msk.f32.vlgmr.msrb.gmra.mxu3 %vm249_vm0, %v243_v39 }
  0xd3   : > { %588 = vmatmul.msk.f32.gmra.mxu1 %vm249_vm0, %v241_v40 }
  0xd9   : > { %591 = vmatmul.msk.f32.gmra.mxu3 %vm249_vm0, %v244_v42 }
  0xdb   : > { %589 = vmatmul.msk.f32.gmra.mxu1 %vm249_vm0, %v242_v43 }
 0x130   : > { %v291_v44 = vpop.f32.mrf.mxu1 }
 0x131   : > { %v315_v45 = vmax.f32 %v291_v44, 0.0  ;;  %v325_v44 = vmul.f32 10.0, %v922_v23 }
 0x133   : > { %v592_v46 = vmul.f32 -1.442695, %v315_v45 }
 0x135   : > { %683 = vpow2.f32 %v592_v46 }
 0x138   : > { %v294_v47 = vpop.f32.mrf.mxu1 }
 0x139   : > { %v316_v48 = vmax.f32 %v294_v47, 0.0 }
 0x13b   : > { %v684_v49 = vpop.eup %683  ;;  %v593_v50 = vmul.f32 -1.442695, %v316_v48 }
 0x13c   : > { %v355_v51 = vadd.f32 1.0, %v684_v49 }
 0x13d   : > { %685 = vpow2.f32 %v593_v50 }
 0x13e   : > { %687 = vrcp.f32 %v355_v51  ;;  %v374_v60 = vand.u32 2147483648, %v355_v51  ;;  %v372_v63 = vand.u32 2147483647, %v355_v51  ;;  %vm368_vm2 = vweird.f32 %v355_v51 }
 0x140   : > { %v297_v52 = vpop.f32.mrf.mxu1  ;;  %v375_v6 = vor.u32 1.1754944e-38, %v374_v60  ;;  %vm373_vm4 = vcmp.eq.f32.partialorder %v372_v63, 8.507059e+37 }
 0x141   : > { %v317_v53 = vmax.f32 %v297_v52, 0.0 }
 0x143   : > { %v686_v54 = vpop.eup %685  ;;  %v594_v55 = vmul.f32 -1.442695, %v317_v53 }
 0x144   : > { %v688_v56 = vpop.eup %687  ;;  %v356_v57 = vadd.f32 1.0, %v686_v54 }
 0x145   : > { %v364_v58 = vmul.f32 %v688_v56, %v355_v51  ;;  %689 = vpow2.f32 %v594_v55  ;;  %vm369_vm1 = vweird.f32 %v688_v56 }
 0x146   : > { %691 = vrcp.f32 %v356_v57  ;;  %vm370_vm3 = vmor %vm368_vm2, %vm369_vm1  ;;  %v389_v13 = vand.u32 2147483648, %v356_v57  ;;  %v387_v16 = vand.u32 2147483647, %v356_v57  ;;  %vm383_vm6 = vweird.f32 %v356_v57 }
 0x147   : > { %v365_v59 = vsub.f32 1.0, %v364_v58 }
 0x148   : > { %v300_v61 = vpop.f32.mrf.mxu1  ;;  %v390_v30 = vor.u32 1.1754944e-38, %v389_v13  ;;  %vm388_vm8 = vcmp.eq.f32.partialorder %v387_v16, 8.507059e+37 }
 0x149   : > { %v366_v62 = vmul.f32 %v688_v56, %v365_v59  ;;  %v318_v0 = vmax.f32 %v300_v61, 0.0 }
 0x14b   : > { %v690_v1 = vpop.eup %689  ;;  %v367_v3 = vadd.f32 %v688_v56, %v366_v62  ;;  %v595_v4 = vmul.f32 -1.442695, %v318_v0  ;;  %v326_v0 = vmul.f32 10.0, %v909_v19 }
 0x14c   : > { %v692_v5 = vpop.eup %691  ;;  %v357_v7 = vadd.f32 1.0, %v690_v1 }
 0x14d   : > { %v371_v8 = vsel %vm370_vm3, %v688_v56, %v367_v3  ;;  %v379_v9 = vmul.f32 %v692_v5, %v356_v57  ;;  %693 = vpow2.f32 %v595_v4  ;;  %vm384_vm5 = vweird.f32 %v692_v5 }
 0x14e   : > { %v376_v10 = vsel %vm373_vm4, %v375_v6, %v371_v8  ;;  %695 = vrcp.f32 %v357_v7  ;;  %vm385_vm7 = vmor %vm383_vm6, %vm384_vm5  ;;  %v402_v39 = vand.u32 2147483647, %v357_v7  ;;  %v404_v21 = vand.u32 2147483648, %v357_v7 }
 0x14f   : > { %v483_v11 = vmul.f32 %v376_v10, %v323_v2  ;;  %v380_v12 = vsub.f32 1.0, %v379_v9  ;;  %vm398_vm10 = vweird.f32 %v357_v7 }
 0x150   : > { %v303_v14 = vpop.f32.mrf.mxu1  ;;  %v405_v49 = vor.u32 1.1754944e-38, %v404_v21  ;;  %vm403_vm12 = vcmp.eq.f32.partialorder %v402_v39, 8.507059e+37 }
 0x151   : > { %491 = vst [vmem:[%s949_s8] sm:$0xff] %v483_v11  ;;  %v381_v15 = vmul.f32 %v692_v5, %v380_v12  ;;  %v319_v17 = vmax.f32 %v303_v14, 0.0 }
 0x153   : > { %v694_v18 = vpop.eup %693  ;;  %v382_v27 = vadd.f32 %v692_v5, %v381_v15  ;;  %v596_v28 = vmul.f32 -1.442695, %v319_v17  ;;  %v327_v15 = vmul.f32 10.0, %v918_v22 }
 0x154   : > { %v696_v29 = vpop.eup %695  ;;  %v358_v31 = vadd.f32 1.0, %v694_v18  ;;  %v309_v32 = vpop.f32.mrf.mxu3 }
 0x155   : > { %v386_v33 = vsel %vm385_vm7, %v692_v5, %v382_v27  ;;  %v394_v34 = vmul.f32 %v696_v29, %v357_v7  ;;  %697 = vpow2.f32 %v596_v28  ;;  %v321_v38 = vmax.f32 %v309_v32, 0.0 }
 0x156   : > { %v391_v35 = vsel %vm388_vm8, %v390_v30, %v386_v33  ;;  %699 = vrcp.f32 %v358_v31  ;;  %vm399_vm9 = vweird.f32 %v696_v29  ;;  %v419_v57 = vand.u32 2147483648, %v358_v31 }
 0x157   : > { %v484_v36 = vmul.f32 %v391_v35, %v324_v26  ;;  %v395_v37 = vsub.f32 1.0, %v394_v34  ;;  %v598_v42 = vmul.f32 -1.442695, %v321_v38  ;;  %vm400_vm11 = vmor %vm398_vm10, %vm399_vm9  ;;  %v417_v60 = vand.u32 2147483647, %v358_v31 }
 0x158   : > { %v306_v40 = vpop.f32.mrf.mxu1  ;;  %vm413_vm14 = vweird.f32 %v358_v31  ;;  %v420_v3 = vor.u32 1.1754944e-38, %v419_v57  ;;  %v329_v35 = vmul.f32 10.0, %v928_v25 }
 0x159   : > { %492 = vst [vmem:[%s949_s8 + $0x8] sm:$0xff] %v484_v36  ;;  %v396_v41 = vmul.f32 %v696_v29, %v395_v37  ;;  %v320_v43 = vmax.f32 %v306_v40, 0.0  ;;  %701 = vpow2.f32 %v598_v42  ;;  %vm418_vm0 = vcmp.eq.f32.partialorder %v417_v60, 8.507059e+37 }
 0x15b   : > { %v698_v45 = vpop.eup %697  ;;  %v397_v46 = vadd.f32 %v696_v29, %v396_v41  ;;  %v597_v47 = vmul.f32 -1.442695, %v320_v43  ;;  %v328_v43 = vmul.f32 10.0, %v924_v24 }
 0x15c   : > { %v700_v48 = vpop.eup %699  ;;  %v359_v50 = vadd.f32 1.0, %v698_v45  ;;  %v312_v51 = vpop.f32.mrf.mxu3 }
 0x15d   : > { %v401_v52 = vsel %vm400_vm11, %v696_v29, %v397_v46  ;;  %v409_v53 = vmul.f32 %v700_v48, %v358_v31  ;;  %703 = vpow2.f32 %v597_v47  ;;  %v322_v23 = vmax.f32 %v312_v51, 0.0 }
 0x15e   : > { %v406_v54 = vsel %vm403_vm12, %v405_v49, %v401_v52  ;;  %705 = vrcp.f32 %v359_v50  ;;  %vm414_vm13 = vweird.f32 %v700_v48  ;;  %v434_v10 = vand.u32 2147483648, %v359_v50 }
 0x15f   : > { %v485_v55 = vmul.f32 %v406_v54, %v325_v44  ;;  %v410_v56 = vsub.f32 1.0, %v409_v53  ;;  %v702_v58 = vpop.eup %701  ;;  %v599_v61 = vmul.f32 -1.442695, %v322_v23  ;;  %vm415_vm15 = vmor %vm413_vm14, %vm414_vm13  ;;  %v432_v12 = vand.u32 2147483647, %v359_v50 }
 0x160   : > { %v361_v62 = vadd.f32 1.0, %v702_v58  ;;  %vm428_vm2 = vweird.f32 %v359_v50  ;;  %v435_v18 = vor.u32 1.1754944e-38, %v434_v10  ;;  %v330_v53 = vmul.f32 10.0, %v911_v20 }
 0x161   : > { %493 = vst [vmem:[%s949_s8 + $0x10] sm:$0xff] %v485_v55  ;;  %v411_v59 = vmul.f32 %v700_v48, %v410_v56  ;;  %707 = vpow2.f32 %v599_v61  ;;  %vm433_vm4 = vcmp.eq.f32.partialorder %v432_v12, 8.507059e+37 }
 0x162   : > { %709 = vrcp.f32 %v361_v62  ;;  %v464_v30 = vand.u32 2147483648, %v361_v62  ;;  %v462_v34 = vand.u32 2147483647, %v361_v62  ;;  %vm458_vm6 = vweird.f32 %v361_v62 }
 0x163   : > { %v704_v63 = vpop.eup %703  ;;  %v412_v1 = vadd.f32 %v700_v48, %v411_v59 }
 0x164   : > { %v706_v2 = vpop.eup %705  ;;  %v360_v6 = vadd.f32 1.0, %v704_v63  ;;  %v465_v39 = vor.u32 1.1754944e-38, %v464_v30  ;;  %vm463_vm9 = vcmp.eq.f32.partialorder %v462_v34, 8.507059e+37 }
 0x165   : > { %v416_v4 = vsel %vm415_vm15, %v700_v48, %v412_v1  ;;  %v424_v5 = vmul.f32 %v706_v2, %v359_v50  ;;  %vm429_vm1 = vweird.f32 %v706_v2 }
 0x166   : > { %v421_v7 = vsel %vm418_vm0, %v420_v3, %v416_v4  ;;  %711 = vrcp.f32 %v360_v6  ;;  %vm430_vm3 = vmor %vm428_vm2, %vm429_vm1  ;;  %v449_v37 = vand.u32 2147483648, %v360_v6  ;;  %v447_v40 = vand.u32 2147483647, %v360_v6 }
 0x167   : > { %v486_v8 = vmul.f32 %v421_v7, %v326_v0  ;;  %v425_v9 = vsub.f32 1.0, %v424_v5  ;;  %v708_v11 = vpop.eup %707  ;;  %vm443_vm10 = vweird.f32 %v360_v6 }
 0x168   : > { %v710_v13 = vpop.eup %709  ;;  %v958_v14 = vadd.f32 1.0, %v708_v11  ;;  %v450_v46 = vor.u32 1.1754944e-38, %v449_v37  ;;  %vm448_vm12 = vcmp.eq.f32.partialorder %v447_v40, 8.507059e+37 }
 0x169   : > { %494 = vst [vmem:[%s949_s8 + $0x18] sm:$0xff] %v486_v8  ;;  %v426_v19 = vmul.f32 %v706_v2, %v425_v9  ;;  %v454_v17 = vmul.f32 %v710_v13, %v361_v62  ;;  %vm459_vm5 = vweird.f32 %v710_v13 }
 0x16a   : > { %713 = vrcp.f32 %v958_v14  ;;  %vm460_vm7 = vmor %vm458_vm6, %vm459_vm5  ;;  %v479_v49 = vand.u32 2147483648, %v958_v14  ;;  %v477_v51 = vand.u32 2147483647, %v958_v14  ;;  %vm473_vm14 = vweird.f32 %v958_v14 }
 0x16b   : > { %v427_v16 = vadd.f32 %v706_v2, %v426_v19  ;;  %v455_v28 = vsub.f32 1.0, %v454_v17 }
 0x16c   : > { %v712_v26 = vpop.eup %711  ;;  %v480_v55 = vor.u32 1.1754944e-38, %v479_v49  ;;  %vm478_vm0 = vcmp.eq.f32.partialorder %v477_v51, 8.507059e+37 }
 0x16d   : > { %v431_v27 = vsel %vm430_vm3, %v706_v2, %v427_v16  ;;  %v439_v31 = vmul.f32 %v712_v26, %v360_v6  ;;  %v456_v33 = vmul.f32 %v710_v13, %v455_v28  ;;  %vm444_vm8 = vweird.f32 %v712_v26 }
 0x16e   : > { %v436_v29 = vsel %vm433_vm4, %v435_v18, %v431_v27  ;;  %vm445_vm11 = vmor %vm443_vm10, %vm444_vm8 }
 0x16f   : > { %v487_v32 = vmul.f32 %v436_v29, %v327_v15  ;;  %v440_v22 = vsub.f32 1.0, %v439_v31  ;;  %v457_v36 = vadd.f32 %v710_v13, %v456_v33 }
 0x170   : > { %v714_v38 = vpop.eup %713 }
 0x171   : > { %495 = vst [vmem:[%s949_s8 + $0x20] sm:$0xff] %v487_v32  ;;  %v441_v21 = vmul.f32 %v712_v26, %v440_v22  ;;  %v461_v41 = vsel %vm460_vm7, %v710_v13, %v457_v36  ;;  %v469_v42 = vmul.f32 %v714_v38, %v958_v14  ;;  %vm474_vm13 = vweird.f32 %v714_v38 }
 0x172   : > { %v466_v44 = vsel %vm463_vm9, %v465_v39, %v461_v41  ;;  %vm475_vm15 = vmor %vm473_vm14, %vm474_vm13 }
 0x173   : > { %v442_v25 = vadd.f32 %v712_v26, %v441_v21  ;;  %v489_v45 = vmul.f32 %v466_v44, %v329_v35  ;;  %v470_v47 = vsub.f32 1.0, %v469_v42 }
 0x175   : > { %v446_v48 = vsel %vm445_vm11, %v712_v26, %v442_v25  ;;  %497 = vst [vmem:[%s949_s8 + $0x30] sm:$0xff] %v489_v45  ;;  %v471_v24 = vmul.f32 %v714_v38, %v470_v47 }
 0x176   : > { %v451_v50 = vsel %vm448_vm12, %v450_v46, %v446_v48 }
 0x177   : > { %v488_v52 = vmul.f32 %v451_v50, %v328_v43  ;;  %v472_v54 = vadd.f32 %v714_v38, %v471_v24 }
 0x179   : > { %496 = vst [vmem:[%s949_s8 + $0x28] sm:$0xff] %v488_v52  ;;  %v476_v56 = vsel %vm475_vm15, %v714_v38, %v472_v54 }
 0x17a   : > { %v481_v23 = vsel %vm478_vm0, %v480_v55, %v476_v56 }
 0x17b   : > { %v490_v57 = vmul.f32 %v481_v23, %v330_v53 }
 0x17d   : > { %498 = vst [vmem:[%s949_s8 + $0x38] sm:$0xff] %v490_v57 }
 0x17e   : > { %742 = shalt.err (!%p739_p3)
}
 0x17f   : > { %s779_s4 = smov 128   ;;  %s780_s5 = smov 8  }
 0x180   : > { %642 = dma.vmem_to_hbm [thread:$0]  (%p839_p5), %s513_s16, 1024, %s515_s20, %s500_s24, %s779_s4, %s779_s4, %s780_s5  }
 0x181 PF: > { %p648_p4 = scmp.ge.s32.totalorder %s777_s15, 2  ;;  %s529_s6 = sand.u32 1, %s765_s12  }
 0x182   : > { %s530_s7 = scalar_lea.sflag [#allocation3], %s529_s6 }
 0x183   : > { %p645_p7 = pnand %p648_p4, %p843_p6 }
 0x185   : > { %p646_p8 = pneg %p645_p7 }
 0x187   : > { %760 = dma.done.wait (%p646_p8), %s530_s7, 1024  }
 0x188   : > { %762 = vsyncadd (%p646_p8), %s530_s7, 4294966272  ;;  %p13_p9 = scmp.ge.s32.totalorder %s826_s18, 4   ;;  %s1013_s12 = smov %s769_s13 }
 0x189   : > { %s1014_s13 = smov %s773_s14  ;;  %s1015_s14 = smov %s837_s21 }
 0x18a   : > { %s1016_s15 = smov %s826_s18  ;;  %15 = sbr.rel (!%p13_p9) target bundleno = 3 (0x3), region = 67 }
 0x18f   :  { %536 = vsyncpa [#allocation3], 1 }
 0x190   :  { %538 = vsyncpa [#allocation3 + $0x1], 1 }

</bundles_post_ra>
